<compile_context>
chip_gen: v5e
topology: v5e:2x2
jax: 0.10.0
libtpu: 0.0.40
codegen_flags: <defaults>
</compile_context>

<pallas_src>
import jax
import jax.numpy as jnp
from jax import lax
from jax.experimental import pallas as pl
from jax.experimental.pallas import tpu as pltpu

_LANES = 128
_INNER_MAX = 8  # chunks per inner fori_loop slice (bounds vreg live ranges)


def _cdiv(a, b):
    return -(-a // b)


def _sublanes_for(dtype):
    # f32 -> 8 sublanes, bf16/f16 -> 16, int8/fp8 -> 32 (vreg packing rule).
    itemsize = jnp.dtype(dtype).itemsize
    table = {4: 8, 2: 16, 1: 32}
    assert itemsize in table, f"unsupported dtype for multiloss kernel: {dtype}"
    return table[itemsize]


def _device_kind():
    try:
        return jax.devices()[0].device_kind.lower()
    except Exception:
        return ""


def _make_partial_sums_kernel(*, sub, chunk_tile, inner, steps_per_core,
                              valid_chunks, needs_mask):
    """Builds the per-grid-step SSE/SAE partial-sum kernel (statics closed over)."""
    n_inner = chunk_tile // inner

    def kernel(out_ref, tgt_ref, sse_ref, sae_ref):
        c = pl.program_id(0)
        j = pl.program_id(1)

        @pl.when(j == 0)
        def _init():
            sse_ref[...] = jnp.zeros_like(sse_ref)
            sae_ref[...] = jnp.zeros_like(sae_ref)

        # Logical (unclamped) first chunk handled by this grid step; used for
        # masking so clamped duplicate / partially-OOB blocks contribute zero.
        base_chunk = (c * steps_per_core + j) * chunk_tile

        def body(i, carry):
            sse, sae = carry
            start = pl.multiple_of(i * inner, inner)
            o = out_ref[pl.ds(start, inner)].astype(jnp.float32)
            t = tgt_ref[pl.ds(start, inner)].astype(jnp.float32)
            d = o - t
            if needs_mask:
                cid = (base_chunk + start
                       + lax.broadcasted_iota(jnp.int32, (inner, sub, _LANES), 0))
                d = jnp.where(cid < valid_chunks, d, 0.0)
            # Pure VPU vertical adds over the leading axis; the cross-lane /
            # cross-sublane reduce to a scalar is deferred to the JAX epilogue.
            sse = sse + jnp.sum(d * d, axis=0, keepdims=True)
            sae = sae + jnp.sum(jnp.abs(d), axis=0, keepdims=True)
            return sse, sae

        zeros = jnp.zeros((1, sub, _LANES), jnp.float32)
        unroll = True if n_inner <= 8 else 4
        sse, sae = lax.fori_loop(0, n_inner, body, (zeros, zeros), unroll=unroll)
        sse_ref[...] += sse
        sae_ref[...] += sae

    return kernel


def multiloss_forward(output, target, log_var, *, num_cores=None,
                      target_block_bytes=None):
    """Pallas implementation of multiloss.forward with [MSE, L1] objectives."""
    assert output.shape == target.shape and output.dtype == target.dtype
    total = int(output.size)
    dtype = output.dtype
    itemsize = jnp.dtype(dtype).itemsize
    sub = _sublanes_for(dtype)
    chunk_elems = sub * _LANES

    # Generation-aware defaults (v5e/v6e: single TensorCore; v7x: 2 TCs,
    # ~3.2 TB/s HBM and only 64 MiB VMEM/TC -> larger blocks, raised limit).
    kind = _device_kind()
    is_v7 = ("v7" in kind) or ("7x" in kind)
    if num_cores is None:
        num_cores = 2 if is_v7 else 1
    if target_block_bytes is None:
        if is_v7:
            target_block_bytes = 8 << 20
        elif "v6" in kind:
            target_block_bytes = 4 << 20
        else:
            target_block_bytes = 2 << 20

    out_flat = output.reshape(-1)   # contiguous flatten: free bitcast
    tgt_flat = target.reshape(-1)

    raw_chunks = total // chunk_elems
    tail = total - raw_chunks * chunk_elems

    sse = jnp.float32(0.0)
    sae = jnp.float32(0.0)

    if raw_chunks > 0:
        if raw_chunks < num_cores:
            num_cores = 1

        bulk = raw_chunks * chunk_elems
        if tail:
            # TODO(synk): the prefix slice may materialize one copy of the bulk
            # when numel % (sub*128) != 0; the divisible case is a free view.
            xb, yb = out_flat[:bulk], tgt_flat[:bulk]
        else:
            xb, yb = out_flat, tgt_flat
        x = xb.reshape(raw_chunks, sub, _LANES)
        y = yb.reshape(raw_chunks, sub, _LANES)

        desired_tile = max(1, target_block_bytes // (chunk_elems * itemsize))
        tile0 = int(min(desired_tile, _cdiv(raw_chunks, num_cores)))
        inner = min(_INNER_MAX, tile0)
        # Multiple of `inner`, never larger than the slab's leading dim.
        chunk_tile = max((tile0 // inner) * inner, inner)
        steps_per_core = int(_cdiv(raw_chunks, num_cores * chunk_tile))
        coverage = num_cores * steps_per_core * chunk_tile
        needs_mask = coverage != raw_chunks
        last_block = max(_cdiv(raw_chunks, chunk_tile) - 1, 0)

        def in_map(c, j):
            # Clamp so we never request a block fully outside the slab; the
            # kernel masks by logical chunk id, so clamped duplicates add 0.
            return (jnp.minimum(c * steps_per_core + j, last_block), 0, 0)

        def out_map(c, j):
            return (c, 0, 0)

        kernel = _make_partial_sums_kernel(
            sub=sub, chunk_tile=chunk_tile, inner=inner,
            steps_per_core=steps_per_core, valid_chunks=raw_chunks,
            needs_mask=needs_mask)

        cost = pl.CostEstimate(
            flops=6 * bulk,
            transcendentals=0,
            bytes_accessed=2 * bulk * itemsize
            + 2 * num_cores * sub * _LANES * 4,
        )

        sse_part, sae_part = pl.pallas_call(
            kernel,
            out_shape=(
                jax.ShapeDtypeStruct((num_cores, sub, _LANES), jnp.float32),
                jax.ShapeDtypeStruct((num_cores, sub, _LANES), jnp.float32),
            ),
            grid_spec=pltpu.PrefetchScalarGridSpec(
                num_scalar_prefetch=0,
                grid=(num_cores, steps_per_core),
                in_specs=[
                    pl.BlockSpec((chunk_tile, sub, _LANES), in_map),  # output slab
                    pl.BlockSpec((chunk_tile, sub, _LANES), in_map),  # target slab
                ],
                out_specs=[
                    pl.BlockSpec((1, sub, _LANES), out_map),  # per-core SSE partial
                    pl.BlockSpec((1, sub, _LANES), out_map),  # per-core SAE partial
                ],
            ),
            compiler_params=pltpu.CompilerParams(
                dimension_semantics=("parallel", "arbitrary"),
                vmem_limit_bytes=48 << 20,
            ),
            cost_estimate=cost,
        )(x, y)

        sse = sse + jnp.sum(sse_part)
        sae = sae + jnp.sum(sae_part)

    if tail or raw_chunks == 0:
        # Sub-chunk remainder (< sub*128 elements): negligible, plain JAX.
        ro = out_flat[raw_chunks * chunk_elems:].astype(jnp.float32)
        rt = tgt_flat[raw_chunks * chunk_elems:].astype(jnp.float32)
        dr = ro - rt
        sse = sse + jnp.sum(dr * dr)
        sae = sae + jnp.sum(jnp.abs(dr))

    n = jnp.float32(total if total > 0 else 1)
    per_obj = jnp.stack([sse / n, sae / n])   # [MSE, MAE]
    lv = log_var.astype(jnp.float32)
    return jnp.sum(jnp.exp(-lv) * per_obj + lv)


def multiloss_reference(output, target, log_var):
    """Plain-JAX reference mirroring the PyTorch module with [MSE, L1]."""
    d = output.astype(jnp.float32) - target.astype(jnp.float32)
    mse = jnp.mean(d * d)
    mae = jnp.mean(jnp.abs(d))
    per_obj = jnp.stack([mse, mae])
    lv = log_var.astype(jnp.float32)
    return jnp.sum(jnp.exp(-lv) * per_obj + lv)


if __name__ == "__main__":
    key = jax.random.PRNGKey(0)
    k1, k2 = jax.random.split(key)

    # NCHW inputs, small shapes.
    B, C, H, W = 2, 4, 16, 16
    output = jax.random.normal(k1, (B, C, H, W), dtype=jnp.float32)
    target = jax.random.normal(k2, (B, C, H, W), dtype=jnp.float32)

    # nn.Parameter(torch.zeros(objective_num)) -> deterministic zeros, 2 objectives.
    objective_num = 2
    log_var = jnp.zeros((objective_num,), dtype=jnp.float32)

    loss = multiloss_forward(output, target, log_var)
    loss = jax.block_until_ready(loss)

    ref = multiloss_reference(output, target, log_var)
    assert jnp.allclose(loss, ref, rtol=1e-5, atol=1e-5), (loss, ref)

    print("KERNEL_OK")
</pallas_src>

<mosaic_0001>
module attributes {stable_mosaic.version = 11 : i64} {
  func.func @kernel(%arg0: i32, %arg1: i32, %arg2: memref<2x8x128xf32, #tpu.memory_space<vmem>>, %arg3: memref<2x8x128xf32, #tpu.memory_space<vmem>>, %arg4: memref<1x8x128xf32, #tpu.memory_space<vmem>>, %arg5: memref<1x8x128xf32, #tpu.memory_space<vmem>>) attributes {dimension_semantics = [#tpu.dimension_semantics<parallel>, #tpu.dimension_semantics<arbitrary>], iteration_bounds = array<i64: 1, 1>, scalar_prefetch = 0 : i64, scratch_operands = 0 : i64, tpu.core_type = #tpu.core_type<tc>, window_params = [{transform_indices = @transform_0, window_bounds = array<i64: 2, 8, 128>}, {transform_indices = @transform_1, window_bounds = array<i64: 2, 8, 128>}, {transform_indices = @transform_2, window_bounds = array<i64: 1, 8, 128>}, {transform_indices = @transform_3, window_bounds = array<i64: 1, 8, 128>}]} {
    %c0_i32 = arith.constant 0 : i32
    %0 = arith.cmpi eq, %arg1, %c0_i32 : i32
    %1 = arith.extui %0 : i1 to i32
    %c0_i32_0 = arith.constant 0 : i32
    %2 = arith.cmpi ne, %1, %c0_i32_0 : i32
    scf.if %2 {
      %cst_19 = arith.constant 0.000000e+00 : f32
      %25 = vector.broadcast %cst_19 : f32 to vector<1x8x128xf32>
      %c0_20 = arith.constant 0 : index
      %c0_21 = arith.constant 0 : index
      %c0_22 = arith.constant 0 : index
      %26 = vector.load %arg4[%c0_20, %c0_21, %c0_22] : memref<1x8x128xf32, #tpu.memory_space<vmem>>, vector<1x8x128xf32>
      tpu.vector_store %arg4[%c0_20, %c0_21, %c0_22], %25 {strides = array<i32>} : memref<1x8x128xf32, #tpu.memory_space<vmem>>, vector<1x8x128xf32>,
      %cst_23 = arith.constant 0.000000e+00 : f32
      %27 = vector.broadcast %cst_23 : f32 to vector<1x8x128xf32>
      %c0_24 = arith.constant 0 : index
      %c0_25 = arith.constant 0 : index
      %c0_26 = arith.constant 0 : index
      %28 = vector.load %arg5[%c0_24, %c0_25, %c0_26] : memref<1x8x128xf32, #tpu.memory_space<vmem>>, vector<1x8x128xf32>
      tpu.vector_store %arg5[%c0_24, %c0_25, %c0_26], %27 {strides = array<i32>} : memref<1x8x128xf32, #tpu.memory_space<vmem>>, vector<1x8x128xf32>,
    } else {
    }
    %cst = arith.constant 0.000000e+00 : f32
    %3 = vector.broadcast %cst : f32 to vector<1x8x128xf32>
    %c0_i32_1 = arith.constant 0 : i32
    %c2_i32 = arith.constant 2 : i32
    %4 = arith.muli %c0_i32_1, %c2_i32 : i32
    %5 = tpu.assume_multiple %4, 2 : i32
    %6 = arith.index_cast %5 : i32 to index
    %c0 = arith.constant 0 : index
    %c0_2 = arith.constant 0 : index
    %7 = vector.load %arg2[%6, %c0, %c0_2] : memref<2x8x128xf32, #tpu.memory_space<vmem>>, vector<2x8x128xf32>
    %8 = arith.index_cast %5 : i32 to index
    %c0_3 = arith.constant 0 : index
    %c0_4 = arith.constant 0 : index
    %9 = vector.load %arg3[%8, %c0_3, %c0_4] : memref<2x8x128xf32, #tpu.memory_space<vmem>>, vector<2x8x128xf32>
    %10 = arith.subf %7, %9 : vector<2x8x128xf32>
    %11 = arith.mulf %10, %10 : vector<2x8x128xf32>
    %cst_5 = arith.constant dense<0.000000e+00> : vector<8x128xf32>
    %12 = vector.multi_reduction <add>, %11, %cst_5 [0] : vector<2x8x128xf32> to vector<8x128xf32>
    %13 = vector.shape_cast %12 : vector<8x128xf32> to vector<1x8x128xf32>
    %14 = arith.addf %3, %13 : vector<1x8x128xf32>
    %15 = math.absf %10 : vector<2x8x128xf32>
    %cst_6 = arith.constant dense<0.000000e+00> : vector<8x128xf32>
    %16 = vector.multi_reduction <add>, %15, %cst_6 [0] : vector<2x8x128xf32> to vector<8x128xf32>
    %17 = vector.shape_cast %16 : vector<8x128xf32> to vector<1x8x128xf32>
    %18 = arith.addf %3, %17 : vector<1x8x128xf32>
    %c1_i32 = arith.constant 1 : i32
    %c0_7 = arith.constant 0 : index
    %c0_8 = arith.constant 0 : index
    %c0_9 = arith.constant 0 : index
    %19 = vector.load %arg4[%c0_7, %c0_8, %c0_9] : memref<1x8x128xf32, #tpu.memory_space<vmem>>, vector<1x8x128xf32>
    %20 = arith.addf %19, %14 : vector<1x8x128xf32>
    %c0_10 = arith.constant 0 : index
    %c0_11 = arith.constant 0 : index
    %c0_12 = arith.constant 0 : index
    %21 = vector.load %arg4[%c0_10, %c0_11, %c0_12] : memref<1x8x128xf32, #tpu.memory_space<vmem>>, vector<1x8x128xf32>
    tpu.vector_store %arg4[%c0_10, %c0_11, %c0_12], %20 {strides = array<i32>} : memref<1x8x128xf32, #tpu.memory_space<vmem>>, vector<1x8x128xf32>,
    %c0_13 = arith.constant 0 : index
    %c0_14 = arith.constant 0 : index
    %c0_15 = arith.constant 0 : index
    %22 = vector.load %arg5[%c0_13, %c0_14, %c0_15] : memref<1x8x128xf32, #tpu.memory_space<vmem>>, vector<1x8x128xf32>
    %23 = arith.addf %22, %18 : vector<1x8x128xf32>
    %c0_16 = arith.constant 0 : index
    %c0_17 = arith.constant 0 : index
    %c0_18 = arith.constant 0 : index
    %24 = vector.load %arg5[%c0_16, %c0_17, %c0_18] : memref<1x8x128xf32, #tpu.memory_space<vmem>>, vector<1x8x128xf32>
    tpu.vector_store %arg5[%c0_16, %c0_17, %c0_18], %23 {strides = array<i32>} : memref<1x8x128xf32, #tpu.memory_space<vmem>>, vector<1x8x128xf32>,
    return
  }
  func.func @transform_0(%arg0: i32, %arg1: i32) -> (i32, i32, i32) {
    %c1_i32 = arith.constant 1 : i32
    %0 = arith.muli %arg0, %c1_i32 : i32
    %1 = arith.addi %0, %arg1 : i32
    %c0_i32 = arith.constant 0 : i32
    %2 = arith.minsi %1, %c0_i32 : i32
    %c0_i32_0 = arith.constant 0 : i32
    %c0_i32_1 = arith.constant 0 : i32
    %c0_i32_2 = arith.constant 0 : i32
    return %2, %c0_i32_0, %c0_i32_1 : i32, i32, i32
  }
  func.func @transform_1(%arg0: i32, %arg1: i32) -> (i32, i32, i32) {
    %c1_i32 = arith.constant 1 : i32
    %0 = arith.muli %arg0, %c1_i32 : i32
    %1 = arith.addi %0, %arg1 : i32
    %c0_i32 = arith.constant 0 : i32
    %2 = arith.minsi %1, %c0_i32 : i32
    %c0_i32_0 = arith.constant 0 : i32
    %c0_i32_1 = arith.constant 0 : i32
    %c0_i32_2 = arith.constant 0 : i32
    return %2, %c0_i32_0, %c0_i32_1 : i32, i32, i32
  }
  func.func @transform_2(%arg0: i32, %arg1: i32) -> (i32, i32, i32) {
    %c0_i32 = arith.constant 0 : i32
    %c0_i32_0 = arith.constant 0 : i32
    %c0_i32_1 = arith.constant 0 : i32
    return %arg0, %c0_i32, %c0_i32_0 : i32, i32, i32
  }
  func.func @transform_3(%arg0: i32, %arg1: i32) -> (i32, i32, i32) {
    %c0_i32 = arith.constant 0 : i32
    %c0_i32_0 = arith.constant 0 : i32
    %c0_i32_1 = arith.constant 0 : i32
    return %arg0, %c0_i32, %c0_i32_0 : i32, i32, i32
  }
}

</mosaic_0001>

<bundles_post_ra>
// kernel: tpu_custom_call.1
= control target key start
LH: loop header
LB: loop body
LE: loop exit
PB: predicated region body
PF: predicated region fallthrough
CT: control target
= control target key end

     0   :  { %9 = vsyncpa [#allocation3], 0  ;;  %s283_s0 = inlined_call_operand.hbm [shape: f32[2,8,128], index: 0, kind: input, shape index: {}]   ;;  %s284_s1 = inlined_call_operand.hbm [shape: f32[2,8,128], index: 1, kind: input, shape index: {}]   ;;  %s285_s2 = inlined_call_operand.hbm [shape: f32[1,8,128], index: 2, kind: output, shape index: {0}]   ;;  %s286_s3 = inlined_call_operand.hbm [shape: f32[1,8,128], index: 3, kind: output, shape index: {1}]  }
   0x1   :  { %10 = vsyncpa [#allocation6], 0 }
   0x2   :  { %11 = vsyncpa [#allocation4], 0 }
   0x3   :  { %12 = vsyncpa [#allocation9], 0  ;;  %s23_s14 = sshll.u32 %s283_s0, 4  ;;  %s245_s15 = smov [#allocation2]   ;;  %s24_s14 = int_to_ptr.hbm [resolvable:$true] %s23_s14 }
   0x4   :  { %s25_s16 = sshll.u32 %s245_s15, 4  ;;  %s42_s19 = sshll.u32 %s284_s1, 4  ;;  %s26_s16 = int_to_ptr.vmem [resolvable:$true] %s25_s16  ;;  %s43_s19 = int_to_ptr.hbm [resolvable:$true] %s42_s19 }
   0x5   :  { %s246_s20 = smov 128   ;;  %s247_s21 = smov 8  }
   0x6   :  { %31 = dma.hbm_to_vmem [thread:$0]  %s24_s14, 256, %s26_s16, [#allocation3], %s246_s20, %s246_s20, %s247_s21  }
   0x7   :  { %s248_s22 = smov [#allocation5]  }
   0x8   :  { %s44_s23 = sshll.u32 %s248_s22, 4  ;;  %s45_s23 = int_to_ptr.vmem [resolvable:$true] %s44_s23 }
   0x9   :  { %50 = dma.hbm_to_vmem [thread:$0]  %s43_s19, 256, %s45_s23, [#allocation6], %s246_s20, %s246_s20, %s247_s21  }
   0xa   :  { %237 = dma.done.wait [#allocation3], 256  }
   0xb   :  { %238 = vsyncadd [#allocation3], 4294967040 }
   0xc   :  { %239 = dma.done.wait [#allocation6], 256  }
   0xd   :  { %240 = vsyncadd [#allocation6], 4294967040  ;;  %v75_v0 = vld [vmem:[#allocation2] sm:$0xff]  ;;  %v76_v1 = vld [vmem:[#allocation2 + $0x8] sm:$0xff]  ;;  %s249_s0 = smov [#allocation7]   ;;  %s103_s26 = sshll.u32 %s285_s2, 4  ;;  %s104_s26 = int_to_ptr.hbm [resolvable:$true] %s103_s26 }
   0xe   :  { %v78_v2 = vld [vmem:[#allocation5] sm:$0xff]  ;;  %v79_v3 = vld [vmem:[#allocation5 + $0x8] sm:$0xff]  ;;  %s101_s1 = sshll.u32 %s249_s0, 4  ;;  %s250_s27 = smov [#allocation8]   ;;  %s102_s1 = int_to_ptr.vmem [resolvable:$true] %s101_s1 }
   0xf   :  { %v80_v4 = vsub.f32 %v75_v0, %v78_v2  ;;  %v81_v5 = vsub.f32 %v76_v1, %v79_v3  ;;  %s112_s28 = sshll.u32 %s250_s27, 4  ;;  %s114_s4 = sshll.u32 %s286_s3, 4  ;;  %s113_s28 = int_to_ptr.vmem [resolvable:$true] %s112_s28  ;;  %s115_s4 = int_to_ptr.hbm [resolvable:$true] %s114_s4 }
  0x11   :  { %v82_v6 = vmul.f32 %v80_v4, %v80_v4  ;;  %v86_v7 = vand.u32 2147483647, %v80_v4  ;;  %v83_v8 = vmul.f32 %v81_v5, %v81_v5  ;;  %v87_v9 = vand.u32 2147483647, %v81_v5 }
  0x13   :  { %v84_v10 = vadd.f32 %v83_v8, %v82_v6  ;;  %v88_v11 = vadd.f32 %v87_v9, %v86_v7 }
  0x15   :  { %92 = vst [vmem:[#allocation7] sm:$0xff] %v84_v10 }
  0x16   :  { %95 = vst [vmem:[#allocation8] sm:$0xff] %v88_v11  ;;  %106 = dma.vmem_to_hbm [thread:$0]  %s102_s1, 128, %s104_s26, [#allocation4]  }
  0x17   :  { %117 = dma.vmem_to_hbm [thread:$0]  %s113_s28, 128, %s115_s4, [#allocation9]  }
  0x18   :  { %241 = dma.done.wait [#allocation4], 128  }
  0x19   :  { %242 = vsyncadd [#allocation4], 4294967168 }
  0x1a   :  { %243 = dma.done.wait [#allocation9], 128  }
  0x1b   :  { %244 = vsyncadd [#allocation9], 4294967168 }
  0x1c   :  { %126 = vsyncpa [#allocation3], 1 }
  0x1d   :  { %127 = vsyncpa [#allocation6], 1 }
  0x1e   :  { %128 = vsyncpa [#allocation4], 1 }
  0x1f   :  { %129 = vsyncpa [#allocation9], 1 }

</bundles_post_ra>
